<compile_context>
chip_gen: v7x
topology: tpu7x:2x2x1
jax: 0.10.0
libtpu: 0.0.40
codegen_flags: <defaults>
</compile_context>

<pallas_src>
import functools

import jax
import jax.numpy as jnp
from jax.experimental import pallas as pl
from jax.experimental.pallas import tpu as pltpu


def _round_up(x: int, m: int) -> int:
    return ((x + m - 1) // m) * m


def _sublane_rows(dtype) -> int:
    """Minimum sublane-aligned row count for the table dtype."""
    bits = jnp.dtype(dtype).itemsize * 8
    if bits >= 32:
        return 8
    if bits == 16:
        return 16
    return 32


def _pick_block_tokens(S: int, D: int, dtype, *, want: int = 512, nslots: int = 3,
                       vmem_budget_bytes: int = 12 * 1024 * 1024) -> int:
    """Largest sublane-aligned token block <= `want` that fits the VMEM budget
    (nslots gather slots + ~2 Pallas output buffers)."""
    sub = _sublane_rows(dtype)
    row_bytes = max(1, D * jnp.dtype(dtype).itemsize)
    max_tok = max(sub, vmem_budget_bytes // ((nslots + 2) * row_bytes))
    tok = min(want, max_tok, _round_up(S, sub))
    tok = max(sub, (tok // sub) * sub)
    return tok


def _word_emb_kernel(ids_ref, *refs, tok, n_s, nslots, with_mask):
    """One grid step (b, s): gather `tok` embedding rows for sequence block s
    of sample b from HBM (manual multi-buffered DMA), optionally apply the
    SpatialDropout channel mask, store the lane-dense (tok, D) output block.

    ids_ref  : SMEM (B * S_pad,) int32   scalar prefetch (flat token ids)
    mask_ref : VMEM (1, 1, D)            dropout scale row for sample b (opt)
    emb_hbm  : HBM  (V, D)               raw ref, manual DMA gather
    o_ref    : VMEM (tok, D)             output block (lane-dense last dim)
    buf      : VMEM (nslots, tok, D)     gather slots
    sem      : DMA semaphores (nslots,)  one per slot (aggregated wait)
    """
    if with_mask:
        mask_ref, emb_hbm, o_ref, buf, sem = refs
    else:
        emb_hbm, o_ref, buf, sem = refs
        mask_ref = None

    b = pl.program_id(0)
    s = pl.program_id(1)
    seq_pad = n_s * tok

    def issue(blk, slot):
        # Gather the `tok` rows of sequence block `blk` of sample b into slot.
        base = b * seq_pad + blk * tok

        @pl.loop(0, tok)
        def _(j):
            row = ids_ref[base + j]
            pltpu.make_async_copy(
                emb_hbm.at[pl.ds(row, 1)],
                buf.at[slot, pl.ds(j, 1)],
                sem.at[slot],
            ).start()

    # Prime the pipeline at the start of each batch row (per-core on megacore).
    n_prime = min(nslots - 1, n_s)
    if n_prime:
        @pl.when(s == 0)
        def _():
            for d in range(n_prime):
                issue(d, d)

    # Steady state: keep up to `nslots` blocks of row gathers in flight.
    if n_s > nslots - 1:
        nxt = s + (nslots - 1)

        @pl.when(nxt < n_s)
        def _():
            issue(nxt, nxt % nslots)

    # Aggregated wait: the `tok` row copies of this block all signalled
    # sem[slot]; wait once for the full (tok, D) block worth of bytes instead
    # of tok per-row waits (removes the dummy-source descriptors entirely).
    slot = s % nslots
    pltpu.make_async_copy(buf.at[slot], buf.at[slot], sem.at[slot]).wait()

    block = buf[slot]
    if with_mask:
        # Fused SpatialDropout: broadcast (1, D) channel mask over the block.
        block = block * mask_ref[0]
    o_ref[...] = block.astype(o_ref.dtype)


def spatial_dropout_mask(key, p, batch, dim, dtype=jnp.float32):
    """(B, D) per-(sample, channel) keep/scale mask == nn.Dropout2d training."""
    keep = jax.random.bernoulli(key, 1.0 - p, (batch, dim))
    return keep.astype(dtype) / jnp.asarray(1.0 - p, dtype)


def word_emb_forward(word_ids, emb_table, drop_mask=None, *,
                     block_tokens=None, nslots=3):
    """word_ids (B, S) int, emb_table (V, D) -> (B, S, D).

    drop_mask: (B, D) SpatialDropout scale mask, or None for eval (identity,
    compiled without the mask operand / multiply).
    """
    B, S = word_ids.shape
    V, D = emb_table.shape
    dtype = emb_table.dtype
    with_mask = drop_mask is not None

    sub = _sublane_rows(dtype)
    tok = block_tokens or _pick_block_tokens(S, D, dtype, nslots=nslots)
    tok = max(sub, (tok // sub) * sub)          # sublane-aligned blocks only
    seq_pad = _round_up(S, tok)                 # pad seq to a block multiple
    n_s = seq_pad // tok

    ids = word_ids.astype(jnp.int32)
    if seq_pad != S:
        ids = jnp.pad(ids, ((0, 0), (0, seq_pad - S)))   # pad tokens -> row 0
    ids_flat = ids.reshape(B * seq_pad)

    in_specs = []
    operands = []
    if with_mask:
        mask3 = drop_mask.astype(dtype).reshape(B, 1, D)
        # Constant within a sample, so consecutive inner steps skip the re-DMA.
        in_specs.append(pl.BlockSpec((1, 1, D), lambda b, s, ids: (b, 0, 0)))
        operands.append(mask3)
    in_specs.append(pl.BlockSpec(memory_space=pl.ANY))    # table stays in HBM
    operands.append(emb_table)

    grid_spec = pltpu.PrefetchScalarGridSpec(
        num_scalar_prefetch=1,
        grid=(B, n_s),
        in_specs=in_specs,
        # Flat (B*S_pad, D) output -> lane-dense, sublane-aligned (tok, D) blocks.
        out_specs=pl.BlockSpec((tok, D), lambda b, s, ids: (b * n_s + s, 0)),
        scratch_shapes=[
            pltpu.VMEM((nslots, tok, D), dtype),
            pltpu.SemaphoreType.DMA((nslots,)),
        ],
    )

    kernel = functools.partial(
        _word_emb_kernel, tok=tok, n_s=n_s, nslots=nslots, with_mask=with_mask)

    out_flat = pl.pallas_call(
        kernel,
        out_shape=jax.ShapeDtypeStruct((B * seq_pad, D), dtype),
        grid_spec=grid_spec,
        compiler_params=pltpu.CompilerParams(
            # Batch axis can be sharded across TensorCores (v7x / megacore);
            # the seq axis carries the manual DMA pipeline state.
            dimension_semantics=("parallel", "arbitrary"),
            # Sized for v7x's 64 MiB VMEM (buffers are capped ~12 MiB anyway);
            # v6e could raise this and block_tokens further.
            vmem_limit_bytes=32 * 1024 * 1024,
        ),
    )(ids_flat, *operands)

    out = out_flat.reshape(B, seq_pad, D)
    if seq_pad != S:
        out = out[:, :S]
    return out


def _reference_forward(word_ids, emb_table, drop_mask=None):
    """Plain-JAX reference mirroring word_emb.forward."""
    out = jnp.take(emb_table, word_ids, axis=0)          # (B, S, D)
    if drop_mask is not None:
        out = out * drop_mask[:, None, :]
    return out


if __name__ == "__main__":
    # Small shapes consistent with the module: (BATCH, SEQ_LEN) ids, (V, D) table.
    B, S, V, D = 2, 16, 64, 128

    key = jax.random.PRNGKey(0)
    k_ids, k_emb, k_drop = jax.random.split(key, 3)

    word_ids = jax.random.randint(k_ids, (B, S), 0, V, dtype=jnp.int32)
    emb_table = jax.random.normal(k_emb, (V, D), jnp.float32)

    # Eval mode: SpatialDropout is the identity (mask-free fast path).
    out_eval = jax.block_until_ready(word_emb_forward(word_ids, emb_table))
    ref_eval = _reference_forward(word_ids, emb_table)
    assert out_eval.shape == (B, S, D)
    assert jnp.allclose(out_eval, ref_eval, atol=1e-6, rtol=1e-6), "eval mismatch"

    # Training mode: deterministic per-(sample, channel) dropout mask.
    p = 0.25
    mask = spatial_dropout_mask(k_drop, p, B, D)
    out_train = jax.block_until_ready(
        word_emb_forward(word_ids, emb_table, drop_mask=mask))
    ref_train = _reference_forward(word_ids, emb_table, drop_mask=mask)
    assert jnp.allclose(out_train, ref_train, atol=1e-6, rtol=1e-6), "train mismatch"

    # Ragged seq-len path (S not a multiple of the block): padded then sliced.
    S2 = 12
    word_ids2 = jax.random.randint(k_ids, (B, S2), 0, V, dtype=jnp.int32)
    out2 = jax.block_until_ready(word_emb_forward(word_ids2, emb_table))
    ref2 = _reference_forward(word_ids2, emb_table)
    assert out2.shape == (B, S2, D)
    assert jnp.allclose(out2, ref2, atol=1e-6, rtol=1e-6), "padded-seq mismatch"

    print("KERNEL_OK")
</pallas_src>

<mosaic_0001>
module attributes {stable_mosaic.version = 11 : i64} {
  func.func @_word_emb_kernel(%arg0: i32, %arg1: i32, %arg2: memref<32xi32, #tpu.memory_space<smem>>, %arg3: memref<64x128xf32, #tpu.memory_space<any>>, %arg4: memref<16x128xf32, #tpu.memory_space<vmem>>, %arg5: memref<3x16x128xf32, #tpu.memory_space<vmem>>, %arg6: memref<3x!tpu.dma_semaphore, #tpu.memory_space<semaphore_mem>>) attributes {dimension_semantics = [#tpu.dimension_semantics<parallel>, #tpu.dimension_semantics<arbitrary>], iteration_bounds = array<i64: 2, 1>, scalar_prefetch = 1 : i64, scratch_operands = 2 : i64, tpu.core_type = #tpu.core_type<tc>, window_params = [{}, {transform_indices = @transform_1, window_bounds = array<i64: 16, 128>}]} {
    %c0_i32 = arith.constant 0 : i32
    %0 = arith.cmpi eq, %arg1, %c0_i32 : i32
    %1 = arith.extui %0 : i1 to i32
    %c0_i32_0 = arith.constant 0 : i32
    %2 = arith.cmpi ne, %1, %c0_i32_0 : i32
    scf.if %2 {
      %c16_i32 = arith.constant 16 : i32
      %23 = arith.muli %arg0, %c16_i32 : i32
      %c0_i32_12 = arith.constant 0 : i32
      %24 = arith.addi %23, %c0_i32_12 : i32
      %c0_i32_13 = arith.constant 0 : i32
      %c16_i32_14 = arith.constant 16 : i32
      %25 = arith.addi %c0_i32_13, %c16_i32_14 : i32
      %c1_i32_15 = arith.constant 1 : i32
      scf.for %arg7 = %c0_i32_13 to %25 step %c1_i32_15  : i32 {
        %c1_i32_17 = arith.constant 1 : i32
        %26 = arith.muli %arg7, %c1_i32_17 : i32
        %c0_i32_18 = arith.constant 0 : i32
        %27 = arith.addi %c0_i32_18, %26 : i32
        %28 = arith.addi %24, %27 : i32
        %29 = arith.index_cast %28 : i32 to index
        %30 = memref.load %arg2[%29] : memref<32xi32, #tpu.memory_space<smem>>
        %c0_i32_19 = arith.constant 0 : i32
        %c0_i32_20 = arith.constant 0 : i32
        %c0_i32_21 = arith.constant 0 : i32
        %31 = tpu.memref_slice %arg3[%30, %c0_i32_21] : memref<64x128xf32, #tpu.memory_space<any>> -> memref<1x128xf32, #tpu.memory_space<any>>
        %c0_i32_22 = arith.constant 0 : i32
        %32 = tpu.memref_slice %arg5[%c0_i32_19, %27, %c0_i32_22] : memref<3x16x128xf32, #tpu.memory_space<vmem>> -> memref<1x1x128xf32, #tpu.memory_space<vmem>>
        %33 = tpu.memref_squeeze %32 : memref<1x1x128xf32, #tpu.memory_space<vmem>> -> memref<1x128xf32, #tpu.memory_space<vmem>>
        %34 = tpu.memref_slice %arg6[%c0_i32_20] : memref<3x!tpu.dma_semaphore, #tpu.memory_space<semaphore_mem>> -> memref<1x!tpu.dma_semaphore, #tpu.memory_space<semaphore_mem>>
        %35 = tpu.memref_squeeze %34 : memref<1x!tpu.dma_semaphore, #tpu.memory_space<semaphore_mem>> -> memref<!tpu.dma_semaphore, #tpu.memory_space<semaphore_mem>>
        tpu.enqueue_dma source(%31 : memref<1x128xf32, #tpu.memory_space<any>>) target(%33 : memref<1x128xf32, #tpu.memory_space<vmem>>) target_semaphore(%35 : memref<!tpu.dma_semaphore, #tpu.memory_space<semaphore_mem>>)
      }
      %c16_i32_16 = arith.constant 16 : i32
    } else {
    }
    %c3_i32 = arith.constant 3 : i32
    %c0_i32_1 = arith.constant 0 : i32
    %3 = arith.cmpi eq, %c3_i32, %c0_i32_1 : i32
    %c1_i32 = arith.constant 1 : i32
    %4 = arith.select %3, %c1_i32, %c3_i32 : i32
    %5 = arith.remsi %arg1, %4 : i32
    %c0_i32_2 = arith.constant 0 : i32
    %6 = arith.cmpi ne, %5, %c0_i32_2 : i32
    %c0_i32_3 = arith.constant 0 : i32
    %7 = arith.cmpi slt, %5, %c0_i32_3 : i32
    %c0_i32_4 = arith.constant 0 : i32
    %8 = arith.cmpi slt, %4, %c0_i32_4 : i32
    %9 = arith.xori %7, %8 : i1
    %10 = arith.andi %9, %6 : i1
    %11 = arith.addi %5, %4 : i32
    %12 = arith.select %10, %11, %5 : i32
    %c0_i32_5 = arith.constant 0 : i32
    %c0_i32_6 = arith.constant 0 : i32
    %13 = tpu.memref_slice %arg5[%12, %c0_i32_5, %c0_i32_6] : memref<3x16x128xf32, #tpu.memory_space<vmem>> -> memref<1x16x128xf32, #tpu.memory_space<vmem>>
    %14 = tpu.memref_squeeze %13 : memref<1x16x128xf32, #tpu.memory_space<vmem>> -> memref<16x128xf32, #tpu.memory_space<vmem>>
    %c0_i32_7 = arith.constant 0 : i32
    %c0_i32_8 = arith.constant 0 : i32
    %15 = tpu.memref_slice %arg5[%12, %c0_i32_7, %c0_i32_8] : memref<3x16x128xf32, #tpu.memory_space<vmem>> -> memref<1x16x128xf32, #tpu.memory_space<vmem>>
    %16 = tpu.memref_squeeze %15 : memref<1x16x128xf32, #tpu.memory_space<vmem>> -> memref<16x128xf32, #tpu.memory_space<vmem>>
    %17 = tpu.memref_slice %arg6[%12] : memref<3x!tpu.dma_semaphore, #tpu.memory_space<semaphore_mem>> -> memref<1x!tpu.dma_semaphore, #tpu.memory_space<semaphore_mem>>
    %18 = tpu.memref_squeeze %17 : memref<1x!tpu.dma_semaphore, #tpu.memory_space<semaphore_mem>> -> memref<!tpu.dma_semaphore, #tpu.memory_space<semaphore_mem>>
    tpu.wait_dma2 semaphore(%18 : memref<!tpu.dma_semaphore, #tpu.memory_space<semaphore_mem>>) src(%14 : memref<16x128xf32, #tpu.memory_space<vmem>>) dst(%16 : memref<16x128xf32, #tpu.memory_space<vmem>>)
    %19 = arith.index_cast %12 : i32 to index
    %c0 = arith.constant 0 : index
    %c0_9 = arith.constant 0 : index
    %20 = vector.load %arg5[%19, %c0, %c0_9] : memref<3x16x128xf32, #tpu.memory_space<vmem>>, vector<1x16x128xf32>
    %21 = vector.shape_cast %20 : vector<1x16x128xf32> to vector<16x128xf32>
    %c0_10 = arith.constant 0 : index
    %c0_11 = arith.constant 0 : index
    %22 = vector.load %arg4[%c0_10, %c0_11] : memref<16x128xf32, #tpu.memory_space<vmem>>, vector<16x128xf32>
    tpu.vector_store %arg4[%c0_10, %c0_11], %21 {strides = array<i32>} : memref<16x128xf32, #tpu.memory_space<vmem>>, vector<16x128xf32>,
    return
  }
  func.func @transform_1(%arg0: i32, %arg1: i32, %arg2: memref<32xi32, #tpu.memory_space<smem>>) -> (i32, i32) {
    %c1_i32 = arith.constant 1 : i32
    %0 = arith.muli %arg0, %c1_i32 : i32
    %1 = arith.addi %0, %arg1 : i32
    %c0_i32 = arith.constant 0 : i32
    %c0_i32_0 = arith.constant 0 : i32
    return %1, %c0_i32 : i32, i32
  }
}

</mosaic_0001>

<bundles_post_ra>
// kernel: tpu_custom_call.1
= control target key start
LH: loop header
LB: loop body
LE: loop exit
PB: predicated region body
PF: predicated region fallthrough
CT: control target
= control target key end

     0   :  { %s541_s0 = inlined_call_operand.hbm [shape: s32[32], index: 0, kind: input, shape index: {}]   ;;  %s542_s1 = inlined_call_operand.hbm [shape: f32[64,128], index: 1, kind: input, shape index: {}]   ;;  %s543_s2 = inlined_call_operand.hbm [shape: f32[32,128], index: 2, kind: output, shape index: {}]  }
   0x1   :  { %s277_s11 = scalar_lea.hbm %s541_s0, 16 }
   0x2   :  { %p278_p0 = scmp.ne.s32.totalorder %s541_s0, %s277_s11  ;;  %p281_p1 = scmp.lt.u32.totalorder %s277_s11, %s541_s0 }
   0x4   :  { %p283_p2 = pnand %p281_p1, %p278_p0 }
   0x6   :  { %286 = shalt.err (!%p283_p2)  }
   0x7   :  { %s387_s16 = smov [#allocation5]  }
   0x8   :  { %8 = dma.hbm_to_smem %s541_s0, 16, %s387_s16, [#allocation4] }
   0x9   :  { %359 = dma.done.wait [#allocation4], 16 }
   0xa   :  { %360 = vsyncadd [#allocation4], 4294967280 }
   0xb   :  { %10 = sfence }
   0xc   :  { %11 = vsyncpa [#allocation7], 0 }
   0xd   :  { %13 = vsyncpa [#allocation7 + $0x1], 0  ;;  %s419_s19 = smov 0   ;;  %s421_s20 = smov 0  }
   0xe   :  { %s423_s21 = smov 0   ;;  %s425_s22 = smov 0  }
   0xf LB: > { %s28_s0 = sadd.s32 1, %s377_s21  ;;  %s212_s23 = sadd.s32 4294967295, %s381_s22   ;;  %s381_s22 = sphi %s425_s22, %s19_s22   ;;  %s377_s21 = sphi %s423_s21, %s549_s21   ;;  %s373_s20 = sphi %s421_s20, %s548_s20   ;;  %s369_s19 = sphi %s419_s19, %s547_s19  }
  0x10   : > { %p30_p3 = scmp.ge.s32.totalorder %s28_s0, 2  ;;  %p46_p4 = scmp.ne.s32.totalorder %s373_s20, %s369_s19 }
  0x11   : > { %s37_s24 = sadd.s32 1, %s373_s20  ;;  %p47_p5 = scmp.eq.s32.totalorder %s212_s23, 1 }
  0x12   : > { %s551_s0 = smov (%p30_p3, %s28_s0), 0  ;;  %p41_p6 = scmp.eq.s32.totalorder %s381_s22, 1 }
  0x13   : > { %s34_s25 = ssub.s32 %s377_s21, %s551_s0  ;;  %p449_p9 = por %p47_p5, %p46_p4 }
  0x14   : > { %p35_p7 = scmp.eq.s32.totalorder %s34_s25, 0  ;;  %p213_p8 = scmp.ne.s32.totalorder %s34_s25, 0 }
  0x15   : > { %s544_s26 = scalar_select %p449_p9, 1, 0 }
  0x16   : > { %s454_s27 = scalar_select %p35_p7, %s373_s20, %s37_s24  }
  0x17   : > { %p456_p10 = por %p213_p8, %p41_p6  ;;  %p214_p11 = scmp.ge.s32.totalorder %s381_s22, 2 }
  0x18   : > { %s61_s29 = sand.u32 (!%p214_p11), 1, %s373_s20   ;;  %s216_s30 = sshll.u32 (!%p214_p11), %s377_s21, 4 }
  0x19   : > { %56 = sbr.rel (%p214_p11) target bundleno = 98 (0x62), region = 12  ;;  %s215_s3 = sshll.u32 (!%p214_p11), %s61_s29, 4 }
  0x1a   : > { %s465_s4 = scalar_lea.vmem (!%p214_p11), [#allocation6], %s215_s3  ;;  %s467_s5 = smov (!%p214_p11), 0  }
  0x20 LB: >> { %s77_s6 = sadd.s32 %s385_s5, %s216_s30  ;;  %s81_s8 = scalar_lea.vmem [#allocation2], %s385_s5  ;;  %s385_s5 = sphi %s467_s5, %s76_s5  }
  0x21   : >> { %s78_s7 = sld [smem:[#allocation5 + %s77_s6]]  ;;  %s89_s9 = sshll.u32 %s81_s8, 4  ;;  %s90_s9 = int_to_ptr.vmem [resolvable:$true] %s89_s9 }
  0x22   : >> { %s289_s17 = scalar_lea.hbm %s542_s1, 1024 }
  0x27   : >> { %s217_s10 = sshll.u32 %s78_s7, 4 }
  0x28   : >> { %s80_s13 = scalar_lea.hbm %s542_s1, %s217_s10 }
  0x29   : >> { %s287_s14 = scalar_lea.hbm %s80_s13, 16  ;;  %p290_p13 = scmp.lt.u32.totalorder %s80_s13, %s542_s1 }
  0x2a   : >> { %p288_p12 = scmp.ne.s32.totalorder %s80_s13, %s287_s14  ;;  %p291_p0 = scmp.lt.u32.totalorder %s289_s17, %s287_s14 }
  0x2b   : >> { %p293_p2 = scmp.lt.u32.totalorder %s287_s14, %s80_s13 }
  0x2c   : >> { %p292_p1 = por %p291_p0, %p290_p13 }
  0x2e   : >> { %p294_p3 = por %p293_p2, %p292_p1 }
  0x30   : >> { %p295_p4 = pnand %p294_p3, %p288_p12 }
  0x32   : >> { %298 = shalt.err (!%p295_p4)  }
  0x33   : >> { %s299_s24 = scalar_lea.vmem %s90_s9, 16  ;;  %s388_s25 = smov [#allocation2]  }
  0x34   : >> { %p300_p5 = scmp.ne.s32.totalorder %s90_s9, %s299_s24  ;;  %s301_s3 = sshll.u32 %s388_s25, 4  ;;  %s302_s3 = int_to_ptr.vmem [resolvable:$false] %s301_s3 }
  0x35   : >> { %s303_s6 = scalar_lea.vmem %s302_s3, 768  ;;  %p304_p6 = scmp.lt.s32.totalorder %s90_s9, %s302_s3 }
  0x36   : >> { %p305_p7 = scmp.lt.s32.totalorder %s303_s6, %s299_s24 }
  0x38   : >> { %p306_p8 = por %p305_p7, %p304_p6 }
  0x3a   : >> { %p307_p11 = pnand %p306_p8, %p300_p5 }
  0x3c   : >> { %310 = shalt.err (!%p307_p11)  }
  0x3d   : >> { %92 = dma.hbm_to_vmem [thread:$0]  %s80_s13, 16, %s90_s9, [#allocation3] }
  0x3e   : >> { %s76_s5 = sadd.s32 1, %s385_s5  }
  0x3f   : >> { %p73_p9 = scmp.ge.s32.totalorder %s76_s5, 16  }
  0x41   : > { %75 = sbr.rel (!%p73_p9) target bundleno = 32 (0x20), region = 65 }
  0x48   : > { %361 = dma.done.wait [#allocation3], 256 }
  0x49   : > { %362 = vsyncadd [#allocation3], 4294967040  ;;  %s226_s7 = sshll.u32 %s377_s21, 8  ;;  %s131_s8 = sshll.u32 %s465_s4, 4  ;;  %v112_v0 = vld [vmem:[#allocation2] sm:$0xff]  ;;  %v113_v1 = vld [vmem:[#allocation2 + $0x8] sm:$0xff]  ;;  %s495_s8 = int_to_ptr.vmem [resolvable:$true] %s131_s8 }
  0x4a   : > { %s493_s9 = scalar_lea.hbm %s543_s2, %s226_s7  ;;  %114 = vst [vmem:[%s465_s4] sm:$0xff] %v112_v0  ;;  %115 = vst [vmem:[%s465_s4 + $0x8] sm:$0xff] %v113_v1  ;;  %s501_s30 = scalar_lea.sflag [#allocation7], %s61_s29 }
  0x4b   : > { %s311_s5 = scalar_lea.vmem %s495_s8, 256  ;;  %s389_s21 = smov [#allocation6]  }
  0x4c   : > { %p312_p9 = scmp.ne.s32.totalorder %s495_s8, %s311_s5  ;;  %s315_s12 = sshll.u32 %s389_s21, 4  ;;  %s316_s12 = int_to_ptr.vmem [resolvable:$false] %s315_s12 }
  0x4d   : > { %s317_s13 = scalar_lea.vmem %s316_s12, 512  ;;  %p318_p0 = scmp.lt.s32.totalorder %s495_s8, %s316_s12 }
  0x4e   : > { %p313_p12 = pnand %p312_p9, %p456_p10  ;;  %p319_p1 = scmp.lt.s32.totalorder %s317_s13, %s311_s5 }
  0x50   : > { %p314_p13 = pneg %p313_p12  ;;  %p320_p2 = por %p319_p1, %p318_p0 }
  0x52   : > { %p321_p3 = pnand %p320_p2, %p314_p13 }
  0x54   : > { %324 = shalt.err (!%p321_p3)
}
  0x55   : > { %s325_s29 = scalar_lea.hbm %s493_s9, 256  ;;  %s329_s15 = scalar_lea.hbm %s543_s2, 512 }
  0x56   : > { %p326_p4 = scmp.ne.s32.totalorder %s493_s9, %s325_s29  ;;  %p330_p7 = scmp.lt.u32.totalorder %s493_s9, %s543_s2 }
  0x57   : > { %p331_p8 = scmp.lt.u32.totalorder %s329_s15, %s325_s29  ;;  %p333_p9 = scmp.lt.u32.totalorder %s325_s29, %s493_s9 }
  0x58   : > { %p327_p5 = pnand %p326_p4, %p456_p10 }
  0x59   : > { %p332_p11 = por %p331_p8, %p330_p7 }
  0x5a   : > { %p328_p6 = pneg %p327_p5 }
  0x5b   : > { %p334_p12 = por %p333_p9, %p332_p11 }
  0x5d   : > { %p335_p13 = pnand %p334_p12, %p328_p6 }
  0x5f   : > { %338 = shalt.err (!%p335_p13)
}
  0x60   : > { %s390_s18 = smov 128   ;;  %s391_s23 = smov 8  }
  0x61   : > { %227 = dma.vmem_to_hbm [thread:$0]  (%p456_p10), %s495_s8, 256, %s493_s9, %s501_s30, %s390_s18, %s390_s18, %s391_s23  }
  0x62 PF: > { %p233_p0 = scmp.ge.s32.totalorder %s381_s22, 1  ;;  %s146_s24 = sand.u32 1, %s369_s19  }
  0x63   : > { %p546_p1 = scmp.ne.s32.totalorder %s544_s26, 0  ;;  %s147_s25 = scalar_lea.sflag [#allocation7], %s146_s24 }
  0x65   : > { %p230_p2 = pnand %p233_p0, %p546_p1 }
  0x67   : > { %364 = dma.done.wait (!%p230_p2), %s147_s25, 256  }
  0x68   : > { %366 = vsyncadd (!%p230_p2), %s147_s25, 4294967040  ;;  %s19_s22 = sadd.s32 1, %s381_s22   ;;  %s547_s19 = smov %s373_s20 }
  0x69   : > { %p16_p3 = scmp.ge.s32.totalorder %s19_s22, 3   ;;  %s548_s20 = smov %s454_s27 }
  0x6a   : > { %s549_s21 = smov %s551_s0 }
  0x6b   :  { %18 = sbr.rel (!%p16_p3) target bundleno = 15 (0xf), region = 76 }
  0x72   :  { %152 = vsyncpa [#allocation7], 1 }
  0x73   :  { %154 = vsyncpa [#allocation7 + $0x1], 1 }
  0x74   :  { %155 = vsyncmov [#allocation3] }
  0x77   :  { %s156_s26 = vpop.sfrf %155 }
  0x78   :  { %p223_p10 = scmp.ne.s32.totalorder %s156_s26, 0 }
  0x7a   :  { %160 = shalt.err (%p223_p10)  }
  0x7b   :  { %162 = vsyncmov [#allocation3 + $0x1] }
  0x7e   :  { %s163_s28 = vpop.sfrf %162 }
  0x7f   :  { %p224_p4 = scmp.ne.s32.totalorder %s163_s28, 0 }
  0x81   :  { %167 = shalt.err (%p224_p4)  }
  0x82   :  { %169 = vsyncmov [#allocation3 + $0x2] }
  0x85   :  { %s170_s3 = vpop.sfrf %169 }
  0x86   :  { %p225_p5 = scmp.ne.s32.totalorder %s170_s3, 0 }
  0x88   :  { %174 = shalt.err (%p225_p5)  }

</bundles_post_ra>
